<compile_context>
chip_gen: v7x
topology: tpu7x:2x2x1
jax: 0.10.0
libtpu: 0.0.40
codegen_flags: <defaults>
</compile_context>

<pallas_src>
import functools
import math

import jax
import jax.numpy as jnp
from jax.experimental import pallas as pl
from jax.experimental.pallas import tpu as pltpu

# ----------------------------- AWQ config (synthetic) ------------------------
W_BIT = 4
GROUP_SIZE = 128          # AwqConfig.q_group_size default
QMAX = 2 ** W_BIT - 1     # 15 (zero_point=True asymmetric quant)
HALF = GROUP_SIZE // 2    # 64: nibble-packing stride inside a group


# ----------------------------- Pallas AWQ GEMM kernel ------------------------
def _awq_gemm_kernel(x_ref, qw_ref, s_ref, z_ref, o_ref, *, n_grp):
    """One (tm, tn) output tile; grid axis 2 walks K in steps of n_grp quant groups.

    qw_ref block is [n_grp * 64, tn] int8: byte r of group g holds code (g, r) in
    its low nibble and code (g, r + 64) in its high nibble. s_ref / z_ref blocks are
    the [n_grp, tn] scales / zero-points for exactly the groups of this K tile.
    """
    k = pl.program_id(2)

    @pl.when(k == 0)
    def _():
        o_ref[...] = jnp.zeros_like(o_ref)

    tn = o_ref.shape[1]

    # Unpack 2 int4 codes per byte (mask-after-shift makes sign extension harmless).
    p = qw_ref[...].astype(jnp.int32).reshape(n_grp, HALF, tn)
    lo = p & 0xF                       # rows 0..63 of each group
    hi = (p >> 4) & 0xF                # rows 64..127 of each group
    q = jnp.concatenate([lo, hi], axis=1).astype(jnp.float32)    # [n_grp, G, tn]

    # Per-group dequant: W = (q - z) * s, then cast to bf16 for the MXU.
    s = s_ref[...].reshape(n_grp, 1, tn)
    z = z_ref[...].reshape(n_grp, 1, tn)
    w = ((q - z) * s).astype(jnp.bfloat16).reshape(n_grp * GROUP_SIZE, tn)

    # bf16 x bf16 matmul with f32 accumulation directly into the resident out block.
    o_ref[...] += jnp.dot(x_ref[...], w, preferred_element_type=jnp.float32)


def _pick_tiles(M, K, N):
    """Tile sizes for the AWQ GEMM (all shapes static under jit)."""
    n_groups = K // GROUP_SIZE
    if n_groups <= 8:
        gpt = n_groups                 # whole K in one step
    elif n_groups % 8 == 0:
        gpt = 8                        # tk = 1024
    else:
        gpt = n_groups                 # TODO(synk): ragged group counts -> one fat K step
    tk = gpt * GROUP_SIZE

    tn = 256 if N % 256 == 0 else 128  # match 256-wide MXU / lane-dense stores

    if M <= 256:
        m_pad = ((M + 7) // 8) * 8
        tm = m_pad
    else:
        m_pad = ((M + 255) // 256) * 256
        tm = 256
    return tm, tn, tk, gpt, m_pad


@jax.jit
def awq_linear(x, qw_packed, scales, zeros):
    """x: [M, K] f32; qw_packed: [K//2, N] int8 (2 nibbles/byte, group-half order);
    scales/zeros: [K//G, N] f32. Returns x @ dequant(W) as f32 [M, N]."""
    M, K = x.shape
    Kh, N = qw_packed.shape
    assert Kh * 2 == K and K % GROUP_SIZE == 0 and N % 128 == 0

    tm, tn, tk, gpt, m_pad = _pick_tiles(M, K, N)
    assert K % tk == 0 and N % tn == 0

    if m_pad != M:
        x = jnp.pad(x, ((0, m_pad - M), (0, 0)))
    x = x.astype(jnp.bfloat16)         # half the x HBM/VMEM traffic; MXU-native

    grid = (m_pad // tm, N // tn, K // tk)

    out = pl.pallas_call(
        functools.partial(_awq_gemm_kernel, n_grp=gpt),
        out_shape=jax.ShapeDtypeStruct((m_pad, N), jnp.float32),
        grid_spec=pltpu.PrefetchScalarGridSpec(
            num_scalar_prefetch=0,
            grid=grid,
            in_specs=[
                pl.BlockSpec((tm, tk), lambda i, j, k: (i, k)),        # x (bf16)
                pl.BlockSpec((tk // 2, tn), lambda i, j, k: (k, j)),   # packed int4 codes
                pl.BlockSpec((gpt, tn), lambda i, j, k: (k, j)),       # scales (this K tile)
                pl.BlockSpec((gpt, tn), lambda i, j, k: (k, j)),       # zeros  (this K tile)
            ],
            out_specs=pl.BlockSpec((tm, tn), lambda i, j, k: (i, j)),
        ),
        compiler_params=pltpu.CompilerParams(
            dimension_semantics=("parallel", "parallel", "arbitrary"),
            vmem_limit_bytes=48 * 1024 * 1024),
    )(x, qw_packed, scales, zeros)

    return out[:M] if m_pad != M else out


# ----------------------------- quantization (glue) ---------------------------
def quantize_awq(w):
    """w: [K, N] float. Zero-point 4-bit group quant along K, nibble-packed 2/byte."""
    K, N = w.shape
    G = GROUP_SIZE
    wg = w.reshape(K // G, G, N)
    mx = wg.max(axis=1, keepdims=True)
    mn = wg.min(axis=1, keepdims=True)
    scale = jnp.maximum((mx - mn) / QMAX, 1e-5)
    zero = jnp.clip(jnp.round(-mn / scale), 0, QMAX)
    q = jnp.clip(jnp.round(wg / scale) + zero, 0, QMAX).astype(jnp.int32)  # [K//G, G, N]

    # Group-half packing: byte r of group g = code(g, r) | code(g, r + 64) << 4.
    # TODO(synk): real AWQ packs 8 nibbles per int32 (qweight/qzeros, column-interleaved);
    # this TPU-friendly 2-per-int8 layout has identical dequant math.
    lo = q[:, :HALF, :]
    hi = q[:, HALF:, :]
    packed = jnp.bitwise_or(lo, jnp.left_shift(hi, 4))                     # 0..255
    packed = jax.lax.bitcast_convert_type(packed.astype(jnp.uint8), jnp.int8)
    qw_packed = packed.reshape(K // 2, N)

    scales = scale.reshape(K // G, N).astype(jnp.float32)
    zeros = zero.reshape(K // G, N).astype(jnp.float32)
    return qw_packed, scales, zeros


def dequant_ref(qw_packed, scales, zeros):
    """Pure-JAX reference dequant of the packed layout -> [K, N] f32."""
    Kh, N = qw_packed.shape
    K = Kh * 2
    p = qw_packed.astype(jnp.int32).reshape(K // GROUP_SIZE, HALF, N)
    lo = p & 0xF
    hi = (p >> 4) & 0xF
    q = jnp.concatenate([lo, hi], axis=1).astype(jnp.float32)              # [K//G, G, N]
    w = (q - zeros[:, None, :]) * scales[:, None, :]
    return w.reshape(K, N)


# ----------------------------- model glue (plain JAX) ------------------------
def rmsnorm(x, w, eps=1e-6):
    var = jnp.mean(x * x, axis=-1, keepdims=True)
    return x * jax.lax.rsqrt(var + eps) * w


def apply_rope(x, pos):
    # x: [B, S, nH, D]
    D = x.shape[-1]
    inv = 1.0 / (10000.0 ** (jnp.arange(0, D, 2, dtype=jnp.float32) / D))
    ang = pos[:, None].astype(jnp.float32) * inv[None, :]        # [S, D/2]
    cos = jnp.concatenate([jnp.cos(ang), jnp.cos(ang)], -1)[None, :, None, :]
    sin = jnp.concatenate([jnp.sin(ang), jnp.sin(ang)], -1)[None, :, None, :]
    x1, x2 = jnp.split(x, 2, axis=-1)
    rot = jnp.concatenate([-x2, x1], -1)
    return x * cos + rot * sin


def attention(q, k, v):
    # q,k,v: [B, S, nH, D]
    B, S, nH, D = q.shape
    scores = jnp.einsum("bqhd,bkhd->bhqk", q, k) / math.sqrt(D)
    mask = jnp.tril(jnp.ones((S, S), dtype=bool))
    scores = jnp.where(mask[None, None], scores, -1e30)
    p = jax.nn.softmax(scores, axis=-1)
    return jnp.einsum("bhqk,bkhd->bqhd", p, v)


def decoder_layer(h, layer, pos, n_heads, head_dim):
    B, S, H = h.shape
    x = rmsnorm(h, layer["ln1"]).reshape(B * S, H)
    qkv = awq_linear(x, *layer["qkv_proj"])                      # fused Q/K/V GEMM
    q, k, v = jnp.split(qkv, 3, axis=-1)
    q = q.reshape(B, S, n_heads, head_dim)
    k = k.reshape(B, S, n_heads, head_dim)
    v = v.reshape(B, S, n_heads, head_dim)
    q = apply_rope(q, pos)
    k = apply_rope(k, pos)
    attn = attention(q, k, v).reshape(B * S, H)
    h = h + awq_linear(attn, *layer["o_proj"]).reshape(B, S, H)

    x = rmsnorm(h, layer["ln2"]).reshape(B * S, H)
    gu = awq_linear(x, *layer["gate_up_proj"])                   # fused gate/up GEMM
    gate, up = jnp.split(gu, 2, axis=-1)
    mlp = awq_linear(jax.nn.silu(gate) * up, *layer["down_proj"]).reshape(B, S, H)
    return h + mlp


def model_forward(params, tokens, n_heads, head_dim):
    B, S = tokens.shape
    h = params["embed"][tokens]                                   # [B, S, H]
    pos = jnp.arange(S)
    for layer in params["layers"]:
        h = decoder_layer(h, layer, pos, n_heads, head_dim)
    h = rmsnorm(h, params["ln_f"])
    # lm_head stays unquantized (modules_to_not_convert semantics) — plain matmul glue.
    logits = jnp.einsum("bsh,hv->bsv", h, params["lm_head"])
    return logits


# ----------------------------- deterministic init ----------------------------
def init_params(key, vocab, hidden, inter, n_layers):
    keys = iter(jax.random.split(key, 64))

    def qlin(k_in, k_out):
        w = jax.random.normal(next(keys), (k_in, k_out), jnp.float32) * 0.05
        return quantize_awq(w)

    layers = []
    for _ in range(n_layers):
        layers.append({
            "ln1": 1.0 + 0.02 * jax.random.normal(next(keys), (hidden,), jnp.float32),
            "ln2": 1.0 + 0.02 * jax.random.normal(next(keys), (hidden,), jnp.float32),
            "qkv_proj": qlin(hidden, 3 * hidden),
            "o_proj": qlin(hidden, hidden),
            "gate_up_proj": qlin(hidden, 2 * inter),
            "down_proj": qlin(inter, hidden),
        })
    return {
        "embed": 0.05 * jax.random.normal(next(keys), (vocab, hidden), jnp.float32),
        "lm_head": 0.05 * jax.random.normal(next(keys), (hidden, vocab), jnp.float32),
        "ln_f": 1.0 + 0.02 * jax.random.normal(next(keys), (hidden,), jnp.float32),
        "layers": layers,
    }


# ----------------------------- main -----------------------------------------
if __name__ == "__main__":
    B, S = 2, 8
    HIDDEN, INTER, VOCAB = 256, 512, 512
    N_HEADS, HEAD_DIM, N_LAYERS = 4, 64, 2

    key = jax.random.PRNGKey(0)
    k_params, k_tok, k_x = jax.random.split(key, 3)
    params = init_params(k_params, VOCAB, HIDDEN, INTER, N_LAYERS)
    tokens = jax.random.randint(k_tok, (B, S), 0, VOCAB)

    # --- sanity-check the Pallas AWQ GEMM against a pure-JAX dequant matmul ---
    # (kernel uses bf16 MXU operands -> compare with a loosened, bf16-appropriate tol)
    x_test = jax.random.normal(k_x, (B * S, HIDDEN), jnp.float32)
    qw, sc, zp = params["layers"][0]["qkv_proj"]
    out_pallas = awq_linear(x_test, qw, sc, zp)
    out_ref = x_test @ dequant_ref(qw, sc, zp)
    max_err = float(jnp.max(jnp.abs(out_pallas - out_ref)))
    assert jnp.allclose(out_pallas, out_ref, rtol=2e-2, atol=2e-2), \
        f"AWQ GEMM mismatch (max abs err {max_err})"

    # --- full forward pass (quantized decoder layers, Pallas hot path) -------
    logits = model_forward(params, tokens, N_HEADS, HEAD_DIM)
    jax.block_until_ready(logits)
    assert logits.shape == (B, S, VOCAB)
    assert bool(jnp.isfinite(logits).all())
    print("KERNEL_OK")
</pallas_src>

<mosaic_0001>
module attributes {stable_mosaic.version = 11 : i64} {
  func.func @_awq_gemm_kernel(%arg0: i32, %arg1: i32, %arg2: i32, %arg3: memref<16x256xbf16, #tpu.memory_space<vmem>>, %arg4: memref<128x256xi8, #tpu.memory_space<vmem>>, %arg5: memref<2x256xf32, #tpu.memory_space<vmem>>, %arg6: memref<2x256xf32, #tpu.memory_space<vmem>>, %arg7: memref<16x256xf32, #tpu.memory_space<vmem>>) attributes {dimension_semantics = [#tpu.dimension_semantics<parallel>, #tpu.dimension_semantics<parallel>, #tpu.dimension_semantics<arbitrary>], iteration_bounds = array<i64: 1, 3, 1>, scalar_prefetch = 0 : i64, scratch_operands = 0 : i64, tpu.core_type = #tpu.core_type<tc>, window_params = [{transform_indices = @transform_0, window_bounds = array<i64: 16, 256>}, {transform_indices = @transform_1, window_bounds = array<i64: 128, 256>}, {transform_indices = @transform_2, window_bounds = array<i64: 2, 256>}, {transform_indices = @transform_3, window_bounds = array<i64: 2, 256>}, {transform_indices = @transform_4, window_bounds = array<i64: 16, 256>}]} {
    %c0_i32 = arith.constant 0 : i32
    %0 = arith.cmpi eq, %arg2, %c0_i32 : i32
    %1 = arith.extui %0 : i1 to i32
    %c0_i32_0 = arith.constant 0 : i32
    %2 = arith.cmpi ne, %1, %c0_i32_0 : i32
    scf.if %2 {
      %cst_13 = arith.constant 0.000000e+00 : f32
      %29 = vector.broadcast %cst_13 : f32 to vector<16x256xf32>
      %c0_14 = arith.constant 0 : index
      %c0_15 = arith.constant 0 : index
      %30 = vector.load %arg7[%c0_14, %c0_15] : memref<16x256xf32, #tpu.memory_space<vmem>>, vector<16x256xf32>
      tpu.vector_store %arg7[%c0_14, %c0_15], %29 {strides = array<i32>} : memref<16x256xf32, #tpu.memory_space<vmem>>, vector<16x256xf32>,
    } else {
    }
    %c0 = arith.constant 0 : index
    %c0_1 = arith.constant 0 : index
    %3 = vector.load %arg4[%c0, %c0_1] : memref<128x256xi8, #tpu.memory_space<vmem>>, vector<128x256xi8>
    %4 = arith.extsi %3 : vector<128x256xi8> to vector<128x256xi32>
    %5 = vector.shape_cast %4 : vector<128x256xi32> to vector<2x64x256xi32>
    %c15_i32 = arith.constant 15 : i32
    %6 = vector.broadcast %c15_i32 : i32 to vector<2x64x256xi32>
    %7 = arith.andi %5, %6 : vector<2x64x256xi32>
    %c4_i32 = arith.constant 4 : i32
    %8 = vector.broadcast %c4_i32 : i32 to vector<2x64x256xi32>
    %9 = arith.shrsi %5, %8 : vector<2x64x256xi32>
    %c15_i32_2 = arith.constant 15 : i32
    %10 = vector.broadcast %c15_i32_2 : i32 to vector<2x64x256xi32>
    %11 = arith.andi %9, %10 : vector<2x64x256xi32>
    %12 = tpu.concatenate %7, %11 in 1 : vector<2x64x256xi32>, vector<2x64x256xi32> -> vector<2x128x256xi32>
    %13 = arith.sitofp %12 : vector<2x128x256xi32> to vector<2x128x256xf32>
    %c0_3 = arith.constant 0 : index
    %c0_4 = arith.constant 0 : index
    %14 = vector.load %arg5[%c0_3, %c0_4] : memref<2x256xf32, #tpu.memory_space<vmem>>, vector<2x256xf32>
    %15 = vector.shape_cast %14 : vector<2x256xf32> to vector<2x1x256xf32>
    %c0_5 = arith.constant 0 : index
    %c0_6 = arith.constant 0 : index
    %16 = vector.load %arg6[%c0_5, %c0_6] : memref<2x256xf32, #tpu.memory_space<vmem>>, vector<2x256xf32>
    %17 = vector.shape_cast %16 : vector<2x256xf32> to vector<2x1x256xf32>
    %18 = vector.broadcast %17 : vector<2x1x256xf32> to vector<2x128x256xf32>
    %19 = arith.subf %13, %18 : vector<2x128x256xf32>
    %20 = vector.broadcast %15 : vector<2x1x256xf32> to vector<2x128x256xf32>
    %21 = arith.mulf %19, %20 : vector<2x128x256xf32>
    %22 = arith.truncf %21 : vector<2x128x256xf32> to vector<2x128x256xbf16>
    %23 = vector.shape_cast %22 : vector<2x128x256xbf16> to vector<256x256xbf16>
    %c0_7 = arith.constant 0 : index
    %c0_8 = arith.constant 0 : index
    %24 = vector.load %arg7[%c0_7, %c0_8] : memref<16x256xf32, #tpu.memory_space<vmem>>, vector<16x256xf32>
    %c0_9 = arith.constant 0 : index
    %c0_10 = arith.constant 0 : index
    %25 = vector.load %arg3[%c0_9, %c0_10] : memref<16x256xbf16, #tpu.memory_space<vmem>>, vector<16x256xbf16>
    %cst = arith.constant dense<0.000000e+00> : vector<16x256xf32>
    %26 = tpu.matmul %25, %23, %cst {dimension_numbers = #tpu.dot_dimension_numbers<[1], [0], [0], [1], [0, 0, 1, 1], [], []>} : vector<16x256xbf16>, vector<256x256xbf16>, vector<16x256xf32> -> vector<16x256xf32>
    %27 = arith.addf %24, %26 : vector<16x256xf32>
    %c0_11 = arith.constant 0 : index
    %c0_12 = arith.constant 0 : index
    %28 = vector.load %arg7[%c0_11, %c0_12] : memref<16x256xf32, #tpu.memory_space<vmem>>, vector<16x256xf32>
    tpu.vector_store %arg7[%c0_11, %c0_12], %27 {strides = array<i32>} : memref<16x256xf32, #tpu.memory_space<vmem>>, vector<16x256xf32>,
    return
  }
  func.func @transform_0(%arg0: i32, %arg1: i32, %arg2: i32) -> (i32, i32) {
    %c0_i32 = arith.constant 0 : i32
    return %arg0, %arg2 : i32, i32
  }
  func.func @transform_1(%arg0: i32, %arg1: i32, %arg2: i32) -> (i32, i32) {
    %c0_i32 = arith.constant 0 : i32
    return %arg2, %arg1 : i32, i32
  }
  func.func @transform_2(%arg0: i32, %arg1: i32, %arg2: i32) -> (i32, i32) {
    %c0_i32 = arith.constant 0 : i32
    return %arg2, %arg1 : i32, i32
  }
  func.func @transform_3(%arg0: i32, %arg1: i32, %arg2: i32) -> (i32, i32) {
    %c0_i32 = arith.constant 0 : i32
    return %arg2, %arg1 : i32, i32
  }
  func.func @transform_4(%arg0: i32, %arg1: i32, %arg2: i32) -> (i32, i32) {
    %c0_i32 = arith.constant 0 : i32
    return %arg0, %arg1 : i32, i32
  }
}

</mosaic_0001>

<bundles_post_ra>
// kernel: awq_linear.1
= control target key start
LH: loop header
LB: loop body
LE: loop exit
PB: predicated region body
PF: predicated region fallthrough
CT: control target
= control target key end

     0   :  { %9 = vsyncpa [#allocation3], 0  ;;  %s1796_s0 = inlined_call_operand.vmem [shape: bf16[16,256], index: 0, kind: input, shape index: {}]   ;;  %s1797_s1 = inlined_call_operand.hbm [shape: s8[128,768], index: 1, kind: input, shape index: {}]   ;;  %s1798_s2 = inlined_call_operand.vmem [shape: f32[2,768], index: 2, kind: input, shape index: {}]   ;;  %s1799_s3 = inlined_call_operand.vmem [shape: f32[2,768], index: 3, kind: input, shape index: {}]   ;;  %s1800_s4 = inlined_call_operand.hbm [shape: f32[16,768], index: 4, kind: output, shape index: {}]  }
   0x1   :  { %11 = vsyncpa [#allocation3 + $0x1], 0 }
   0x2   :  { %12 = vsyncpa [#allocation4], 0 }
   0x3   :  { %14 = vsyncpa [#allocation4 + $0x1], 0  ;;  %s1263_s15 = smov 0   ;;  %s1265_s16 = smov 0  }
   0x4   :  { %s1267_s17 = smov 0   ;;  %s1269_s18 = smov 0  }
   0x5   :  { %s1271_s19 = smov 0   ;;  %s1273_s20 = smov 0  }
   0x6 LB: > { %s1018_s21 = sadd.s32 4294967295, %s1228_s20   ;;  %s1019_s22 = sadd.s32 4294967294, %s1228_s20   ;;  %s1228_s20 = sphi %s1273_s20, %s20_s20   ;;  %s1224_s19 = sphi %s1271_s19, %s1813_s19   ;;  %s1220_s18 = sphi %s1269_s18, %s1812_s18   ;;  %s1216_s17 = sphi %s1267_s17, %s1811_s17   ;;  %s1212_s16 = sphi %s1265_s16, %s1810_s16   ;;  %s1208_s15 = sphi %s1263_s15, %s1809_s15  }
   0x7   : > { %s35_s23 = sadd.s32 1, %s1224_s19  ;;  %s76_s24 = sadd.s32 1, %s1216_s17 }
   0x8   : > { %p37_p0 = scmp.ge.s32.totalorder %s35_s23, 3  ;;  %p83_p1 = scmp.ne.s32.totalorder %s1216_s17, %s1212_s16 }
   0x9   : > { %p84_p2 = scmp.eq.s32.totalorder %s1228_s20, 0  ;;  %p89_p3 = scmp.ne.s32.totalorder %s1212_s16, %s1208_s15 }
   0xa   : > { %s1815_s23 = smov (%p37_p0, %s35_s23), 0  ;;  %p90_p5 = scmp.eq.s32.totalorder %s1018_s21, 0 }
   0xb   : > { %p1304_p4 = por %p84_p2, %p83_p1  ;;  %s72_s26 = ssub.s32 %s1224_s19, %s1815_s23 }
   0xc   : > { %p171_p6 = scmp.eq.s32.totalorder %s1018_s21, 2  ;;  %p74_p7 = scmp.eq.s32.totalorder %s72_s26, 0 }
   0xd   : > { %p1310_p8 = por %p90_p5, %p89_p3  ;;  %p177_p10 = scmp.eq.s32.totalorder %s1019_s22, 2 }
   0xe   : > { %p1314_p9 = por %p171_p6, %p83_p1  ;;  %p1056_p12 = scmp.lt.s32.totalorder %s1228_s20, 3 }
   0xf   : > { %s1319_s29 = scalar_select %p74_p7, %s1216_s17, %s76_s24  }
  0x10   : > { %s1804_s28 = scalar_select %p1314_p9, 1, 0 }
  0x11   : > { %p1321_p11 = por %p177_p10, %p89_p3  ;;  %s212_s5 = sand.u32 1, %s1216_s17  }
  0x12   : > { %s1023_s6 = sshll.u32 %s212_s5, 6  ;;  %s1042_s7 = sshll.u32 %s1224_s19, 8 }
  0x13   : > { %s1805_s30 = scalar_select %p1321_p11, 1, 0 }
  0x14   : > { %s1331_s10 = scalar_lea.hbm %s1797_s1, %s1042_s7  ;;  %s216_s11 = scalar_lea.vmem [#allocation2], %s1023_s6 }
  0x15   : > { %s226_s12 = sshll.u32 %s216_s11, 4  ;;  %p1337_p13 = pnand %p1056_p12, %p1304_p4  ;;  %s1333_s12 = int_to_ptr.vmem [resolvable:$true] %s226_s12 }
  0x16   : > { %s1341_s14 = scalar_lea.sflag [#allocation3], %s212_s5  ;;  %s1116_s21 = scalar_lea.hbm %s1331_s10, 1024 }
  0x17   : > { %p1117_p0 = scmp.ne.s32.totalorder %s1331_s10, %s1116_s21  ;;  %p1118_p1 = pneg %p1337_p13 }
  0x18   : > { %s1121_s25 = scalar_lea.hbm %s1797_s1, 3072  ;;  %p1122_p4 = scmp.lt.u32.totalorder %s1331_s10, %s1797_s1 }
  0x19   : > { %p1119_p2 = pnand %p1118_p1, %p1117_p0  ;;  %p1123_p5 = scmp.lt.u32.totalorder %s1121_s25, %s1116_s21 }
  0x1a   : > { %p1125_p7 = scmp.lt.u32.totalorder %s1116_s21, %s1331_s10 }
  0x1b   : > { %p1120_p3 = pneg %p1119_p2  ;;  %p1124_p6 = por %p1123_p5, %p1122_p4 }
  0x1d   : > { %p1126_p10 = por %p1125_p7, %p1124_p6 }
  0x1f   : > { %p1127_p12 = pnand %p1126_p10, %p1120_p3 }
  0x21   : > { %1130 = shalt.err (!%p1127_p12)
}
  0x22   : > { %s1131_s5 = scalar_lea.vmem %s1333_s12, 1024  ;;  %s1230_s7 = smov [#allocation2]  }
  0x23   : > { %p1132_p0 = scmp.ne.s32.totalorder %s1333_s12, %s1131_s5  ;;  %s1136_s8 = sshll.u32 %s1230_s7, 4  ;;  %s1137_s8 = int_to_ptr.vmem [resolvable:$false] %s1136_s8 }
  0x24   : > { %s1138_s9 = scalar_lea.vmem %s1137_s8, 2048  ;;  %p1139_p9 = scmp.lt.s32.totalorder %s1333_s12, %s1137_s8 }
  0x25   : > { %p1134_p2 = pnand %p1132_p0, %p1118_p1  ;;  %p1140_p4 = scmp.lt.s32.totalorder %s1138_s9, %s1131_s5 }
  0x27   : > { %p1135_p11 = pneg %p1134_p2  ;;  %p1141_p5 = por %p1140_p4, %p1139_p9 }
  0x29   : > { %p1142_p6 = pnand %p1141_p5, %p1135_p11 }
  0x2b   : > { %1145 = shalt.err (!%p1142_p6)
}
  0x2c   : > { %s1231_s11 = smov 768   ;;  %s1232_s21 = smov 256  }
  0x2d   : > { %s1233_s22 = smov 16   ;;  %p1026_p1 = scmp.ge.s32.totalorder %s1228_s20, 1 }
  0x2e   : > { %1051 = dma.hbm_to_vmem [thread:$0]  (!%p1337_p13), %s1331_s10, 1024, %s1333_s12, %s1341_s14, %s1231_s11, %s1232_s21, %s1233_s22  }
  0x2f   : > { %p260_p3 = scmp.lt.s32.totalorder %s1228_s20, 4 }
  0x31   : > { %p261_p7 = pnand %p1026_p1, %p260_p3 }
  0x32   : > { %s1372_s24 = sand.u32 (!%p261_p7), 1, %s1212_s16  }
  0x33   : > { %264 = sbr.rel (%p261_p7) target bundleno = 392 (0x188), region = 36  ;;  %s1027_s25 = sshll.u32 (!%p261_p7), %s1372_s24, 6 }
  0x34   : > { %s267_s26 = scalar_lea.sflag (!%p261_p7), [#allocation3], %s1372_s24  ;;  %s1376_s6 = scalar_lea.vmem (!%p261_p7), [#allocation2], %s1027_s25 }
  0x3a   : > { %1199 = dma.done.wait (%p1310_p8), %s267_s26, 1024  }
  0x3b   : > { %1201 = vsyncadd (%p1310_p8), %s267_s26, 4294966272  ;;  %s1029_s10 = sshll.u32 %s1220_s18, 1  ;;  %v587_v0 = vlaneseq  ;;  %v1394_v4 = vld [vmem:[%s1376_s6 + $0x8] sm:$0xff]  ;;  %v1397_v6 = vld [vmem:[%s1376_s6] sm:$0xff]  ;;  %s1028_s25 = sshll.u32 %s1372_s24, 5 }
  0x3c   : > { %p340_p9 = scmp.lt.s32.totalorder %s1029_s10, 5  ;;  %v376_v7 = vunpack.c.0.s8 %v1394_v4  ;;  %v378_v8 = vunpack.c.1.s8 %v1394_v4  ;;  %v375_v14 = vunpack.c.0.s8 %v1397_v6  ;;  %v377_v15 = vunpack.c.1.s8 %v1397_v6  ;;  %v1115_v28 = vld [vmem:[%s1796_s0 + $0x4] ss:$8 sps:$4 sm:$0xff]   ;;  %s1043_s26 = sshll.u32 %s1220_s18, 8 }
  0x3d   : > { %v588_v1 = vshrl.u32 %v587_v0, 7  ;;  %v380_v26 = vunpack.c.2.s8 %v1394_v4  ;;  %v382_v27 = vunpack.c.3.s8 %v1394_v4  ;;  %v379_v31 = vunpack.c.2.s8 %v1397_v6  ;;  %835 = vmatprep.mubr.bf16.mxu0 %v1115_v28  ;;  %v1447_v41 = vld [vmem:[%s1376_s6 + $0x18] sm:$0xff]  ;;  %v1454_v50 = vld [vmem:[%s1376_s6 + $0x10] sm:$0xff]  ;;  %s1746_s14 = scalar_lea.hbm %s1800_s4, %s1043_s26  ;;  %s855_s18 = scalar_lea.sflag [#allocation4], %s1372_s24 }
  0x3e   : > { %s1817_s10 = smov (!%p340_p9, %s1029_s10), 5  ;;  %v408_v16 = vand.u32 15, %v376_v7  ;;  %v410_v17 = vand.u32 15, %v378_v8  ;;  %v1413_v18 = vshra.s32 %v376_v7, 4  ;;  %v1415_v19 = vshra.s32 %v378_v8, 4  ;;  %p1807_p11 = scmp.ne.s32.totalorder %s1804_s28, 0 }
  0x3f   : > { %s1030_s12 = sshll.u32 %s1817_s10, 1  ;;  %v1383_v2 = vsub.s32 1, %v588_v1  ;;  %v1391_v3 = vsub.s32 0, %v588_v1  ;;  %v407_v20 = vand.u32 15, %v375_v14  ;;  %v409_v21 = vand.u32 15, %v377_v15  ;;  %s1234_s7 = smov [#allocation5]  }
  0x40   : > { %s345_s5 = scalar_lea.vmem %s1798_s2, %s1030_s12  ;;  %s355_s27 = scalar_lea.vmem %s1799_s3, %s1030_s12  ;;  %v504_v24 = vcvt.s32.f32 %v408_v16  ;;  %v506_v25 = vcvt.s32.f32 %v410_v17  ;;  %v381_v32 = vunpack.c.3.s8 %v1397_v6  ;;  %v412_v35 = vand.u32 15, %v380_v26 }
  0x41   : > { %v1033_v5 = vld.sshfl [vmem:[%s345_s5] sm:$0x33 pattern:$0x75316420]  ;;  %v503_v29 = vcvt.s32.f32 %v407_v20  ;;  %v505_v30 = vcvt.s32.f32 %v409_v21  ;;  %v414_v36 = vand.u32 15, %v382_v27  ;;  %v411_v39 = vand.u32 15, %v379_v31 }
  0x42   : > { %v1401_v9 = vcombine.high %v1033_v5, %v1033_v5  ;;  %v1034_v10 = vld.sshfl [vmem:[%s355_s27] sm:$0x33 pattern:$0x75316420]  ;;  %v1404_v11 = vrot.slane %v1033_v5, %v1383_v2  ;;  %v1425_v23 = vrot.slane %v1033_v5, %v1391_v3  ;;  %v413_v40 = vand.u32 15, %v381_v32  ;;  %s1150_s8 = sshll.u32 %s1234_s7, 4  ;;  %s1151_s8 = int_to_ptr.vmem [resolvable:$false] %s1150_s8 }
  0x43   : > { %v1406_v12 = vcombine.high %v1034_v10, %v1034_v10  ;;  %v1409_v13 = vrot.slane %v1034_v10, %v1383_v2  ;;  %v1422_v22 = vrot.slane %v1034_v10, %v1391_v3  ;;  %v508_v44 = vcvt.s32.f32 %v412_v35  ;;  %s1152_s27 = scalar_lea.vmem %s1151_s8, 1024 }
  0x44   : > { %v510_v45 = vcvt.s32.f32 %v414_v36  ;;  %v507_v48 = vcvt.s32.f32 %v411_v39  ;;  %v509_v49 = vcvt.s32.f32 %v413_v40  ;;  %v384_v54 = vunpack.c.0.s8 %v1447_v41 }
  0x45   : > { %v608_v33 = vsub.f32 %v504_v24, %v1409_v13  ;;  %v610_v34 = vsub.f32 %v506_v25, %v1409_v13  ;;  %v607_v37 = vsub.f32 %v503_v29, %v1422_v22  ;;  %v609_v38 = vsub.f32 %v505_v30, %v1422_v22 }
  0x46   : > { %v612_v52 = vsub.f32 %v508_v44, %v1409_v13  ;;  %v614_v53 = vsub.f32 %v510_v45, %v1409_v13  ;;  %v611_v56 = vsub.f32 %v507_v48, %v1422_v22  ;;  %v613_v57 = vsub.f32 %v509_v49, %v1422_v22 }
  0x47   : > { %v692_v42 = vmul.f32 %v1404_v11, %v608_v33  ;;  %v694_v43 = vmul.f32 %v1404_v11, %v610_v34  ;;  %v691_v46 = vmul.f32 %v1425_v23, %v607_v37  ;;  %v693_v47 = vmul.f32 %v1425_v23, %v609_v38 }
  0x48   : > { %v386_v58 = vunpack.c.1.s8 %v1447_v41  ;;  %v696_v59 = vmul.f32 %v1404_v11, %v612_v52  ;;  %v698_v60 = vmul.f32 %v1404_v11, %v614_v53  ;;  %v416_v61 = vand.u32 15, %v384_v54 }
  0x49   : > { %v756_v51 = vpack.c.bf16 %v694_v43, %v692_v42  ;;  %v755_v55 = vpack.c.bf16 %v693_v47, %v691_v46  ;;  %v383_v62 = vunpack.c.0.s8 %v1454_v50  ;;  %v695_v63 = vmul.f32 %v1425_v23, %v611_v56 }
  0x4a   : > { %v697_v0 = vmul.f32 %v1425_v23, %v613_v57  ;;  %v418_v1 = vand.u32 15, %v386_v58  ;;  %v385_v5 = vunpack.c.1.s8 %v1454_v50  ;;  %v758_v7 = vpack.c.bf16 %v698_v60, %v696_v59 }
  0x4b   : > { %803 = vmatprep.subr.bf16.mxu0 %v756_v51  ;;  %v512_v8 = vcvt.s32.f32 %v416_v61  ;;  %v415_v10 = vand.u32 15, %v383_v62  ;;  %v388_v16 = vunpack.c.2.s8 %v1447_v41  ;;  %v390_v24 = vunpack.c.3.s8 %v1447_v41 }
  0x4c   : > { %804 = vmatpush1.bf16.msra.mxu0 %v755_v55  ;;  %v757_v17 = vpack.c.bf16 %v697_v0, %v695_v63  ;;  %v514_v20 = vcvt.s32.f32 %v418_v1  ;;  %v417_v21 = vand.u32 15, %v385_v5  ;;  %v387_v30 = vunpack.c.2.s8 %v1454_v50 }
  0x4d   : > { %805 = vmatprep.subr.bf16.mxu0 %v758_v7  ;;  %v616_v25 = vsub.f32 %v512_v8, %v1409_v13  ;;  %v511_v28 = vcvt.s32.f32 %v415_v10  ;;  %v420_v29 = vand.u32 15, %v388_v16  ;;  %v422_v35 = vand.u32 15, %v390_v24 }
  0x4e   : > { %v618_v33 = vsub.f32 %v514_v20, %v1409_v13  ;;  %v513_v34 = vcvt.s32.f32 %v417_v21  ;;  %v389_v36 = vunpack.c.3.s8 %v1454_v50  ;;  %v419_v40 = vand.u32 15, %v387_v30 }
  0x4f   : > { %v700_v37 = vmul.f32 %v1404_v11, %v616_v25  ;;  %v615_v38 = vsub.f32 %v511_v28, %v1422_v22  ;;  %v516_v39 = vcvt.s32.f32 %v420_v29  ;;  %v518_v44 = vcvt.s32.f32 %v422_v35 }
  0x50   : > { %806 = vmatpush1.bf16.msra.mxu0 %v757_v17  ;;  %v702_v42 = vmul.f32 %v1404_v11, %v618_v33  ;;  %v617_v43 = vsub.f32 %v513_v34, %v1422_v22  ;;  %v421_v45 = vand.u32 15, %v389_v36  ;;  %v515_v48 = vcvt.s32.f32 %v419_v40 }
  0x51   : > { %v699_v46 = vmul.f32 %v1425_v23, %v615_v38  ;;  %v620_v47 = vsub.f32 %v516_v39, %v1409_v13  ;;  %v472_v49 = vand.u32 15, %v1413_v18  ;;  %v622_v53 = vsub.f32 %v518_v44, %v1409_v13 }
  0x52   : > { %v760_v51 = vpack.c.bf16 %v702_v42, %v700_v37  ;;  %v701_v52 = vmul.f32 %v1425_v23, %v617_v43  ;;  %v517_v55 = vcvt.s32.f32 %v421_v45  ;;  %v619_v57 = vsub.f32 %v515_v48, %v1422_v22 }
  0x53   : > { %v704_v56 = vmul.f32 %v1404_v11, %v620_v47  ;;  %v474_v59 = vand.u32 15, %v1415_v19  ;;  %v520_v60 = vcvt.s32.f32 %v472_v49  ;;  %v706_v63 = vmul.f32 %v1404_v11, %v622_v53 }
  0x54   : > { %807 = vmatprep.subr.bf16.mxu0 %v760_v51  ;;  %v759_v61 = vpack.c.bf16 %v701_v52, %v699_v46  ;;  %v621_v0 = vsub.f32 %v517_v55, %v1422_v22  ;;  %v439_v18 = vshra.s32 %v375_v14, 4  ;;  %v703_v1 = vmul.f32 %v1425_v23, %v619_v57 }
  0x55   : > { %v522_v7 = vcvt.s32.f32 %v474_v59  ;;  %v624_v8 = vsub.f32 %v520_v60, %v1409_v13  ;;  %v441_v10 = vshra.s32 %v377_v15, 4  ;;  %v762_v19 = vpack.c.bf16 %v706_v63, %v704_v56 }
  0x56   : > { %808 = vmatpush1.bf16.msra.mxu0 %v759_v61  ;;  %v705_v17 = vmul.f32 %v1425_v23, %v621_v0  ;;  %v471_v20 = vand.u32 15, %v439_v18  ;;  %v444_v21 = vshra.s32 %v380_v26, 4  ;;  %v446_v29 = vshra.s32 %v382_v27, 4 }
  0x57   : > { %v626_v25 = vsub.f32 %v522_v7, %v1409_v13  ;;  %v708_v14 = vmul.f32 %v1404_v11, %v624_v8  ;;  %v473_v28 = vand.u32 15, %v441_v10  ;;  %809 = vmatprep.subr.bf16.mxu0 %v762_v19  ;;  %v443_v35 = vshra.s32 %v379_v31, 4 }
  0x58   : > { %v761_v33 = vpack.c.bf16 %v705_v17, %v703_v1  ;;  %v519_v34 = vcvt.s32.f32 %v471_v20  ;;  %v476_v15 = vand.u32 15, %v444_v21  ;;  %v478_v39 = vand.u32 15, %v446_v29  ;;  %v1549_v21 = vld [vmem:[%s1376_s6 + $0x28] sm:$0xff] }
  0x59   : > { %v710_v37 = vmul.f32 %v1404_v11, %v626_v25  ;;  %v521_v38 = vcvt.s32.f32 %v473_v28  ;;  %v445_v26 = vshra.s32 %v381_v32, 4  ;;  %v475_v4 = vand.u32 15, %v443_v35 }
  0x5a   : > { %810 = vmatpush1.bf16.msra.mxu0 %v761_v33  ;;  %v623_v40 = vsub.f32 %v519_v34, %v1422_v22  ;;  %v524_v42 = vcvt.s32.f32 %v476_v15  ;;  %v448_v27 = vshra.s32 %v384_v54, 4  ;;  %v526_v45 = vcvt.s32.f32 %v478_v39 }
  0x5b   : > { %v764_v43 = vpack.c.bf16 %v710_v37, %v708_v14  ;;  %v625_v44 = vsub.f32 %v521_v38, %v1422_v22  ;;  %v477_v31 = vand.u32 15, %v445_v26  ;;  %v523_v48 = vcvt.s32.f32 %v475_v4 }
  0x5c   : > { %v707_v46 = vmul.f32 %v1425_v23, %v623_v40  ;;  %v628_v47 = vsub.f32 %v524_v42, %v1409_v13  ;;  %v450_v6 = vshra.s32 %v386_v58, 4  ;;  %v630_v49 = vsub.f32 %v526_v45, %v1409_v13 }
  0x5d   : > { %811 = vmatprep.subr.bf16.mxu0 %v764_v43  ;;  %v709_v32 = vmul.f32 %v1425_v23, %v625_v44  ;;  %v525_v51 = vcvt.s32.f32 %v477_v31  ;;  %v480_v54 = vand.u32 15, %v448_v27  ;;  %v627_v53 = vsub.f32 %v523_v48, %v1422_v22  ;;  %v1572_v44 = vld [vmem:[%s1376_s6 + $0x20] sm:$0xff] }
  0x5e   : > { %v712_v52 = vmul.f32 %v1404_v11, %v628_v47  ;;  %v482_v55 = vand.u32 15, %v450_v6  ;;  %v447_v56 = vshra.s32 %v383_v62, 4  ;;  %v714_v59 = vmul.f32 %v1404_v11, %v630_v49 }
  0x5f   : > { %v763_v57 = vpack.c.bf16 %v709_v32, %v707_v46  ;;  %v629_v58 = vsub.f32 %v525_v51, %v1422_v22  ;;  %v528_v60 = vcvt.s32.f32 %v480_v54  ;;  %v711_v61 = vmul.f32 %v1425_v23, %v627_v53 }
  0x60   : > { %v530_v63 = vcvt.s32.f32 %v482_v55  ;;  %v449_v0 = vshra.s32 %v385_v5, 4  ;;  %v479_v18 = vand.u32 15, %v447_v56  ;;  %v766_v1 = vpack.c.bf16 %v714_v59, %v712_v52 }
  0x61   : > { %812 = vmatpush1.bf16.msra.mxu0 %v763_v57  ;;  %v713_v7 = vmul.f32 %v1425_v23, %v629_v58  ;;  %v632_v62 = vsub.f32 %v528_v60, %v1409_v13  ;;  %v452_v8 = vshra.s32 %v388_v16, 4  ;;  %v454_v20 = vshra.s32 %v390_v24, 4 }
  0x62   : > { %v634_v10 = vsub.f32 %v530_v63, %v1409_v13  ;;  %v481_v19 = vand.u32 15, %v449_v0  ;;  %v527_v17 = vcvt.s32.f32 %v479_v18  ;;  %813 = vmatprep.subr.bf16.mxu0 %v766_v1  ;;  %v451_v28 = vshra.s32 %v387_v30, 4 }
  0x63   : > { %v765_v5 = vpack.c.bf16 %v713_v7, %v711_v61  ;;  %v716_v25 = vmul.f32 %v1404_v11, %v632_v62  ;;  %v484_v14 = vand.u32 15, %v452_v8  ;;  %v486_v34 = vand.u32 15, %v454_v20 }
  0x64   : > { %v718_v29 = vmul.f32 %v1404_v11, %v634_v10  ;;  %v529_v16 = vcvt.s32.f32 %v481_v19  ;;  %v631_v33 = vsub.f32 %v527_v17, %v1422_v22  ;;  %v453_v41 = vshra.s32 %v389_v36, 4 }
  0x65   : > { %814 = vmatpush1.bf16.msra.mxu0 %v765_v5  ;;  %v532_v15 = vcvt.s32.f32 %v484_v14  ;;  %v483_v24 = vand.u32 15, %v451_v28  ;;  %v392_v35 = vunpack.c.0.s8 %v1549_v21  ;;  %v534_v39 = vcvt.s32.f32 %v486_v34  ;;  %v1623_v28 = vld [vmem:[%s1376_s6 + $0x30] sm:$0xff] }
  0x66   : > { %v768_v37 = vpack.c.bf16 %v718_v29, %v716_v25  ;;  %v633_v38 = vsub.f32 %v529_v16, %v1422_v22  ;;  %v715_v30 = vmul.f32 %v1425_v23, %v631_v33  ;;  %v485_v40 = vand.u32 15, %v453_v41 }
  0x67   : > { %v636_v26 = vsub.f32 %v532_v15, %v1409_v13  ;;  %v531_v42 = vcvt.s32.f32 %v483_v24  ;;  %v394_v4 = vunpack.c.1.s8 %v1549_v21  ;;  %v638_v36 = vsub.f32 %v534_v39, %v1409_v13 }
  0x68   : > { %815 = vmatprep.subr.bf16.mxu0 %v768_v37  ;;  %v717_v50 = vmul.f32 %v1425_v23, %v633_v38  ;;  %v424_v27 = vand.u32 15, %v392_v35  ;;  %v1569_v43 = vrot.slane %v1406_v12, %v1383_v2  ;;  %v533_v31 = vcvt.s32.f32 %v485_v40 }
  0x69   : > { %v720_v45 = vmul.f32 %v1404_v11, %v636_v26  ;;  %v635_v46 = vsub.f32 %v531_v42, %v1422_v22  ;;  %v426_v47 = vand.u32 15, %v394_v4  ;;  %v722_v13 = vmul.f32 %v1404_v11, %v638_v36 }
  0x6a   : > { %v767_v48 = vpack.c.bf16 %v717_v50, %v715_v30  ;;  %v536_v6 = vcvt.s32.f32 %v424_v27  ;;  %v1581_v32 = vrot.slane %v1401_v9, %v1383_v2  ;;  %v637_v49 = vsub.f32 %v533_v31, %v1422_v22 }
  0x6b   : > { %v719_v51 = vmul.f32 %v1425_v23, %v635_v46  ;;  %v538_v54 = vcvt.s32.f32 %v426_v47  ;;  %v391_v52 = vunpack.c.0.s8 %v1572_v44  ;;  %v770_v53 = vpack.c.bf16 %v722_v13, %v720_v45 }
  0x6c   : > { %816 = vmatpush1.bf16.msra.mxu0 %v767_v48  ;;  %v640_v55 = vsub.f32 %v536_v6, %v1569_v43  ;;  %v393_v56 = vunpack.c.1.s8 %v1572_v44  ;;  %v1590_v11 = vrot.slane %v1406_v12, %v1391_v3  ;;  %v721_v2 = vmul.f32 %v1425_v23, %v637_v49  ;;  %v1606_v23 = vld [vmem:[%s1376_s6 + $0x38] sm:$0xff]  ;;  %s322_s6 = scalar_lea.vmem [#allocation5], %s1028_s25 }
  0x6d   : > { %v642_v22 = vsub.f32 %v538_v54, %v1569_v43  ;;  %v423_v57 = vand.u32 15, %v391_v52  ;;  %v1598_v59 = vrot.slane %v1401_v9, %v1391_v3  ;;  %817 = vmatprep.subr.bf16.mxu0 %v770_v53  ;;  %v396_v12 = vunpack.c.2.s8 %v1549_v21  ;;  %s871_s10 = sshll.u32 %s322_s6, 4  ;;  %s1748_s10 = int_to_ptr.vmem [resolvable:$true] %s871_s10 }
  0x6e   : > { %v724_v58 = vmul.f32 %v1581_v32, %v640_v55  ;;  %v425_v60 = vand.u32 15, %v393_v56  ;;  %v398_v61 = vunpack.c.3.s8 %v1549_v21  ;;  %v769_v63 = vpack.c.bf16 %v721_v2, %v719_v51  ;;  %s1146_s5 = scalar_lea.vmem %s1748_s10, 512  ;;  %p1153_p12 = scmp.lt.s32.totalorder %s1748_s10, %s1151_s8 }
  0x6f   : > { %v726_v0 = vmul.f32 %v1581_v32, %v642_v22  ;;  %v535_v18 = vcvt.s32.f32 %v423_v57  ;;  %v395_v3 = vunpack.c.2.s8 %v1572_v44  ;;  %v428_v1 = vand.u32 15, %v396_v12  ;;  %p1147_p8 = scmp.ne.s32.totalorder %s1748_s10, %s1146_s5  ;;  %p1154_p0 = scmp.lt.s32.totalorder %s1152_s27, %s1146_s5 }
  0x70   : > { %v537_v9 = vcvt.s32.f32 %v425_v60  ;;  %v430_v7 = vand.u32 15, %v398_v61  ;;  %v397_v62 = vunpack.c.3.s8 %v1572_v44  ;;  %818 = vmatpush1.bf16.msra.mxu0 %v769_v63  ;;  %v400_v17 = vunpack.c.0.s8 %v1606_v23 }
  0x71   : > { %v772_v8 = vpack.c.bf16 %v726_v0, %v724_v58  ;;  %v639_v10 = vsub.f32 %v535_v18, %v1590_v11  ;;  %v427_v19 = vand.u32 15, %v395_v3  ;;  %v540_v5 = vcvt.s32.f32 %v428_v1  ;;  %p1148_p13 = pnand %p1147_p8, %p1807_p11  ;;  %p1155_p2 = por %p1154_p0, %p1153_p12 }
  0x72   : > { %v641_v20 = vsub.f32 %v537_v9, %v1590_v11  ;;  %v542_v25 = vcvt.s32.f32 %v430_v7  ;;  %v429_v14 = vand.u32 15, %v397_v62  ;;  %v402_v33 = vunpack.c.1.s8 %v1606_v23 }
  0x73   : > { %819 = vmatprep.subr.bf16.mxu0 %v772_v8  ;;  %v723_v29 = vmul.f32 %v1598_v59, %v639_v10  ;;  %v539_v16 = vcvt.s32.f32 %v427_v19  ;;  %v432_v34 = vand.u32 15, %v400_v17  ;;  %v644_v41 = vsub.f32 %v540_v5, %v1569_v43  ;;  %p1149_p10 = pneg %p1148_p13 }
  0x74   : > { %v725_v15 = vmul.f32 %v1598_v59, %v641_v20  ;;  %v646_v24 = vsub.f32 %v542_v25, %v1569_v43  ;;  %v541_v37 = vcvt.s32.f32 %v429_v14  ;;  %v434_v30 = vand.u32 15, %v402_v33 }
  0x75   : > { %v643_v38 = vsub.f32 %v539_v16, %v1590_v11  ;;  %v544_v39 = vcvt.s32.f32 %v432_v34  ;;  %v399_v26 = vunpack.c.0.s8 %v1623_v28  ;;  %v728_v42 = vmul.f32 %v1581_v32, %v644_v41  ;;  %p1156_p4 = pnand %p1155_p2, %p1149_p10 }
  0x76   : > { %v771_v40 = vpack.c.bf16 %v725_v15, %v723_v29  ;;  %v730_v50 = vmul.f32 %v1581_v32, %v646_v24  ;;  %v645_v36 = vsub.f32 %v541_v37, %v1590_v11  ;;  %v546_v45 = vcvt.s32.f32 %v434_v30 }
  0x77   : > { %v727_v27 = vmul.f32 %v1598_v59, %v643_v38  ;;  %v648_v31 = vsub.f32 %v544_v39, %v1569_v43  ;;  %v401_v46 = vunpack.c.1.s8 %v1623_v28  ;;  %v431_v13 = vand.u32 15, %v399_v26 }
  0x78   : > { %820 = vmatpush1.bf16.msra.mxu0 %v771_v40  ;;  %v774_v47 = vpack.c.bf16 %v730_v50, %v728_v42  ;;  %v729_v48 = vmul.f32 %v1598_v59, %v645_v36  ;;  %v404_v6 = vunpack.c.2.s8 %v1606_v23  ;;  %v650_v49 = vsub.f32 %v546_v45, %v1569_v43 }
  0x79   : > { %v732_v51 = vmul.f32 %v1581_v32, %v648_v31  ;;  %v433_v54 = vand.u32 15, %v401_v46  ;;  %v406_v53 = vunpack.c.3.s8 %v1606_v23  ;;  %v543_v2 = vcvt.s32.f32 %v431_v13 }
  0x7a   : > { %821 = vmatprep.subr.bf16.mxu0 %v774_v47  ;;  %v773_v55 = vpack.c.bf16 %v729_v48, %v727_v27  ;;  %v436_v22 = vand.u32 15, %v404_v6  ;;  %v403_v57 = vunpack.c.2.s8 %v1623_v28  ;;  %v734_v58 = vmul.f32 %v1581_v32, %v650_v49 }
  0x7b   : > { %v545_v60 = vcvt.s32.f32 %v433_v54  ;;  %v438_v63 = vand.u32 15, %v406_v53  ;;  %v405_v0 = vunpack.c.3.s8 %v1623_v28  ;;  %v647_v18 = vsub.f32 %v543_v2, %v1590_v11 }
  0x7c   : > { %822 = vmatpush1.bf16.msra.mxu0 %v773_v55  ;;  %v548_v9 = vcvt.s32.f32 %v436_v22  ;;  %v435_v1 = vand.u32 15, %v403_v57  ;;  %v456_v7 = vshra.s32 %v392_v35, 4  ;;  %v776_v8 = vpack.c.bf16 %v734_v58, %v732_v51 }
  0x7d   : > { %v649_v10 = vsub.f32 %v545_v60, %v1590_v11  ;;  %v550_v19 = vcvt.s32.f32 %v438_v63  ;;  %v437_v20 = vand.u32 15, %v405_v0  ;;  %v731_v5 = vmul.f32 %v1598_v59, %v647_v18 }
  0x7e   : > { %v652_v25 = vsub.f32 %v548_v9, %v1569_v43  ;;  %v547_v14 = vcvt.s32.f32 %v435_v1  ;;  %v458_v29 = vshra.s32 %v394_v4, 4  ;;  %823 = vmatprep.subr.bf16.mxu0 %v776_v8  ;;  %v488_v15 = vand.u32 15, %v456_v7 }
  0x7f   : > { %v733_v16 = vmul.f32 %v1598_v59, %v649_v10  ;;  %v654_v35 = vsub.f32 %v550_v19, %v1569_v43  ;;  %v549_v34 = vcvt.s32.f32 %v437_v20  ;;  %v455_v38 = vshra.s32 %v391_v52, 4 }
  0x80   : > { %v736_v41 = vmul.f32 %v1581_v32, %v652_v25  ;;  %v651_v24 = vsub.f32 %v547_v14, %v1590_v11  ;;  %v490_v37 = vand.u32 15, %v458_v29  ;;  %v552_v40 = vcvt.s32.f32 %v488_v15 }
  0x81   : > { %v775_v30 = vpack.c.bf16 %v733_v16, %v731_v5  ;;  %v738_v39 = vmul.f32 %v1581_v32, %v654_v35  ;;  %v653_v4 = vsub.f32 %v549_v34, %v1590_v11  ;;  %v457_v36 = vshra.s32 %v393_v56, 4 }
  0x82   : > { %v735_v42 = vmul.f32 %v1598_v59, %v651_v24  ;;  %v554_v50 = vcvt.s32.f32 %v490_v37  ;;  %v487_v27 = vand.u32 15, %v455_v38  ;;  %v656_v47 = vsub.f32 %v552_v40, %v1569_v43 }
  0x83   : > { %824 = vmatpush1.bf16.msra.mxu0 %v775_v30  ;;  %v778_v45 = vpack.c.bf16 %v738_v39, %v736_v41  ;;  %v737_v31 = vmul.f32 %v1598_v59, %v653_v4  ;;  %v460_v52 = vshra.s32 %v396_v12, 4  ;;  %v489_v13 = vand.u32 15, %v457_v36 }
  0x84   : > { %v658_v48 = vsub.f32 %v554_v50, %v1569_v43  ;;  %v551_v49 = vcvt.s32.f32 %v487_v27  ;;  %v462_v51 = vshra.s32 %v398_v61, 4  ;;  %v740_v56 = vmul.f32 %v1581_v32, %v656_v47 }
  0x85   : > { %825 = vmatprep.subr.bf16.mxu0 %v778_v45  ;;  %v777_v54 = vpack.c.bf16 %v737_v31, %v735_v42  ;;  %v492_v55 = vand.u32 15, %v460_v52  ;;  %v459_v2 = vshra.s32 %v395_v3, 4  ;;  %v553_v58 = vcvt.s32.f32 %v489_v13 }
  0x86   : > { %v742_v22 = vmul.f32 %v1581_v32, %v658_v48  ;;  %v655_v12 = vsub.f32 %v551_v49, %v1590_v11  ;;  %v494_v60 = vand.u32 15, %v462_v51  ;;  %v461_v21 = vshra.s32 %v397_v62, 4 }
  0x87   : > { %826 = vmatpush1.bf16.msra.mxu0 %v777_v54  ;;  %v556_v63 = vcvt.s32.f32 %v492_v55  ;;  %v491_v61 = vand.u32 15, %v459_v2  ;;  %v464_v18 = vshra.s32 %v400_v17, 4  ;;  %v657_v1 = vsub.f32 %v553_v58, %v1590_v11 }
  0x88   : > { %v780_v9 = vpack.c.bf16 %v742_v22, %v740_v56  ;;  %v739_v3 = vmul.f32 %v1598_v59, %v655_v12  ;;  %v558_v7 = vcvt.s32.f32 %v494_v60  ;;  %v493_v10 = vand.u32 15, %v461_v21 }
  0x89   : > { %v660_v8 = vsub.f32 %v556_v63, %v1569_v43  ;;  %v555_v19 = vcvt.s32.f32 %v491_v61  ;;  %v466_v20 = vshra.s32 %v402_v33, 4  ;;  %v741_v44 = vmul.f32 %v1598_v59, %v657_v1  ;;  %v1113_v1 = vld [vmem:[%s1796_s0] ss:$8 sps:$4 sm:$0xff]  }
  0x8a   : > { %827 = vmatprep.subr.bf16.mxu0 %v780_v9  ;;  %v662_v62 = vsub.f32 %v558_v7, %v1569_v43  ;;  %v496_v5 = vand.u32 15, %v464_v18  ;;  %v463_v17 = vshra.s32 %v399_v26, 4  ;;  %v557_v14 = vcvt.s32.f32 %v493_v10 }
  0x8b   : > { %v744_v25 = vmul.f32 %v1581_v32, %v660_v8  ;;  %v659_v29 = vsub.f32 %v555_v19, %v1590_v11  ;;  %v498_v16 = vand.u32 15, %v466_v20  ;;  %v779_v35 = vpack.c.bf16 %v741_v44, %v739_v3 }
  0x8c   : > { %v746_v34 = vmul.f32 %v1581_v32, %v662_v62  ;;  %v560_v15 = vcvt.s32.f32 %v496_v5  ;;  %v465_v33 = vshra.s32 %v401_v46, 4  ;;  %v661_v41 = vsub.f32 %v557_v14, %v1590_v11 }
  0x8d   : > { %v743_v24 = vmul.f32 %v1598_v59, %v659_v29  ;;  %v562_v37 = vcvt.s32.f32 %v498_v16  ;;  %v495_v38 = vand.u32 15, %v463_v17  ;;  %828 = vmatpush1.bf16.msra.mxu0 %v779_v35  ;;  %v468_v4 = vshra.s32 %v404_v6, 4 }
  0x8e   : > { %v782_v26 = vpack.c.bf16 %v746_v34, %v744_v25  ;;  %v664_v30 = vsub.f32 %v560_v15, %v1569_v43  ;;  %v497_v39 = vand.u32 15, %v465_v33  ;;  %v745_v40 = vmul.f32 %v1598_v59, %v661_v41 }
  0x8f   : > { %v666_v42 = vsub.f32 %v562_v37, %v1569_v43  ;;  %v559_v50 = vcvt.s32.f32 %v495_v38  ;;  %v470_v46 = vshra.s32 %v406_v53, 4  ;;  %v500_v45 = vand.u32 15, %v468_v4 }
  0x90   : > { %829 = vmatprep.subr.bf16.mxu0 %v782_v26  ;;  %v748_v36 = vmul.f32 %v1581_v32, %v664_v30  ;;  %v561_v27 = vcvt.s32.f32 %v497_v39  ;;  %v467_v31 = vshra.s32 %v403_v57, 4  ;;  %v781_v47 = vpack.c.bf16 %v745_v40, %v743_v24 }
  0x91   : > { %v750_v52 = vmul.f32 %v1581_v32, %v666_v42  ;;  %v663_v6 = vsub.f32 %v559_v50, %v1590_v11  ;;  %v502_v48 = vand.u32 15, %v470_v46  ;;  %v564_v49 = vcvt.s32.f32 %v500_v45 }
  0x92   : > { %v665_v13 = vsub.f32 %v561_v27, %v1590_v11  ;;  %v469_v23 = vshra.s32 %v405_v0, 4  ;;  %v499_v53 = vand.u32 15, %v467_v31  ;;  %830 = vmatpush1.bf16.msra.mxu0 %v781_v47 }
  0x93   : > { %v784_v51 = vpack.c.bf16 %v750_v52, %v748_v36  ;;  %v747_v54 = vmul.f32 %v1598_v59, %v663_v6  ;;  %v566_v56 = vcvt.s32.f32 %v502_v48  ;;  %v668_v55 = vsub.f32 %v564_v49, %v1569_v43 }
  0x94   : > { %v749_v57 = vmul.f32 %v1598_v59, %v665_v13  ;;  %v501_v2 = vand.u32 15, %v469_v23  ;;  %v563_v22 = vcvt.s32.f32 %v499_v53 }
  0x95   : > { %831 = vmatprep.subr.bf16.mxu0 %v784_v51  ;;  %v670_v58 = vsub.f32 %v566_v56, %v1569_v43  ;;  %v752_v28 = vmul.f32 %v1581_v32, %v668_v55 }
  0x96   : > { %v783_v12 = vpack.c.bf16 %v749_v57, %v747_v54  ;;  %v565_v0 = vcvt.s32.f32 %v501_v2  ;;  %v667_v60 = vsub.f32 %v563_v22, %v1590_v11 }
  0x97   : > { %v754_v63 = vmul.f32 %v1581_v32, %v670_v58 }
  0x98   : > { %832 = vmatpush1.bf16.msra.mxu0 %v783_v12  ;;  %v669_v21 = vsub.f32 %v565_v0, %v1590_v11  ;;  %v751_v61 = vmul.f32 %v1598_v59, %v667_v60 }
  0x99   : > { %v786_v18 = vpack.c.bf16 %v754_v63, %v752_v28 }
  0x9a   : > { %v753_v9 = vmul.f32 %v1598_v59, %v669_v21 }
  0x9b   : > { %833 = vmatprep.subr.bf16.mxu0 %v786_v18 }
  0x9c   : > { %v785_v43 = vpack.c.bf16 %v753_v9, %v751_v61 }
  0x9e   : > { %834 = vmatpush1.bf16.msra.mxu0 %v785_v43 }
  0xa1   : > { %836 = vmatmul.mubr.bf16.vlgmr.msra.gmra.mrb[0].mxu0 %v1113_v1 }
 0x174   : > { %v837_v32 = vpop.f32.mrb[0].mxu0 }
 0x175   : > { %v839_v11 = vpop.f32.mrb[1].mxu0  ;;  %850 = vst [vmem:[%s322_s6] sm:$0xff] %v837_v32 }
 0x176   : > { %v841_v3 = vpop.f32.mrb[2].mxu0  ;;  %851 = vst [vmem:[%s322_s6 + $0x8] sm:$0xff] %v839_v11 }
 0x177   : > { %v843_v59 = vpop.f32.mrb[3].mxu0  ;;  %852 = vst [vmem:[%s322_s6 + $0x10] sm:$0xff] %v841_v3 }
 0x178   : > { %853 = vst [vmem:[%s322_s6 + $0x18] sm:$0xff] %v843_v59 }
 0x179   : > { %1159 = shalt.err (!%p1156_p4)
}
 0x17a   : > { %s1160_s9 = scalar_lea.hbm %s1746_s14, 512  ;;  %s1164_s22 = scalar_lea.hbm %s1800_s4, 1536 }
 0x17b   : > { %p1161_p5 = scmp.ne.s32.totalorder %s1746_s14, %s1160_s9  ;;  %p1165_p3 = scmp.lt.u32.totalorder %s1746_s14, %s1800_s4 }
 0x17c   : > { %p1166_p7 = scmp.lt.u32.totalorder %s1164_s22, %s1160_s9  ;;  %p1168_p8 = scmp.lt.u32.totalorder %s1160_s9, %s1746_s14 }
 0x17d   : > { %p1162_p6 = pnand %p1161_p5, %p1807_p11 }
 0x17e   : > { %p1167_p9 = por %p1166_p7, %p1165_p3 }
 0x17f   : > { %p1163_p1 = pneg %p1162_p6 }
 0x180   : > { %p1169_p13 = por %p1168_p8, %p1167_p9 }
 0x182   : > { %p1170_p10 = pnand %p1169_p13, %p1163_p1 }
 0x184   : > { %1173 = shalt.err (!%p1170_p10)
}
 0x185   : > { %s1235_s6 = smov 256   ;;  %s1236_s12 = smov 768  }
 0x186   : > { %s1237_s13 = smov 16  }
 0x187   : > { %1046 = dma.vmem_to_hbm [thread:$0]  (%p1807_p11), %s1748_s10, 512, %s1746_s14, %s855_s18, %s1235_s6, %s1236_s12, %s1237_s13  }
 0x188 PF: > { %p1057_p12 = scmp.ge.s32.totalorder %s1228_s20, 2  ;;  %s886_s5 = sand.u32 1, %s1208_s15  }
 0x189   : > { %p1808_p0 = scmp.ne.s32.totalorder %s1805_s30, 0  ;;  %s887_s7 = scalar_lea.sflag [#allocation4], %s886_s5 }
 0x18b   : > { %p1053_p2 = pnand %p1057_p12, %p1808_p0 }
 0x18d   : > { %1203 = dma.done.wait (!%p1053_p2), %s887_s7, 512  }
 0x18e   : > { %1205 = vsyncadd (!%p1053_p2), %s887_s7, 4294966784  ;;  %s20_s20 = sadd.s32 1, %s1228_s20   ;;  %s1809_s15 = smov %s1212_s16 }
 0x18f   : > { %p17_p4 = scmp.ge.s32.totalorder %s20_s20, 5   ;;  %s1810_s16 = smov %s1216_s17 }
 0x190   : > { %s1811_s17 = smov %s1319_s29  ;;  %s1812_s18 = smov %s1224_s19 }
 0x191   : > { %s1813_s19 = smov %s1815_s23  ;;  %19 = sbr.rel (!%p17_p4) target bundleno = 6 (0x6), region = 94 }
 0x198   :  { %892 = vsyncpa [#allocation3], 1 }
 0x199   :  { %894 = vsyncpa [#allocation3 + $0x1], 1 }
 0x19a   :  { %895 = vsyncpa [#allocation4], 1 }
 0x19b   :  { %897 = vsyncpa [#allocation4 + $0x1], 1 }

</bundles_post_ra>
